<compile_context>
chip_gen: v7x
topology: tpu7x:2x2x1
jax: 0.10.0
libtpu: 0.0.40
codegen_flags: <defaults>
</compile_context>

<pallas_src>
import functools

import jax
import jax.numpy as jnp
from jax.experimental import pallas as pl
from jax.experimental.pallas import tpu as pltpu


D_IN = 15                    # decoder_dim (1) + 14 one-hot class dims
D_H = 16
D_OUT = 3

GROUP = 8                    # pixels packed per lane-row
LANES_IN = GROUP * D_IN      # 120 input lanes  (full last dim -> legal block)
LANES_H = GROUP * D_H        # 128 hidden lanes (exactly one lane tile)
LANES_OUT = GROUP * D_OUT    # 24 output lanes  (full last dim -> legal block)

_MIN_GRID_STEPS = 8          # keep the DMA pipeline deep / both v7x TCs busy


def _elu(x):
    # ELU, alpha = 1.0 (torch.nn.ELU default).  jnp.where keeps lowering simple;
    # the unselected exp(big) branch is harmless (select, no arithmetic on it).
    return jnp.where(x > 0, x, jnp.exp(x) - 1.0)


def _decoder_kernel(x_ref, w1_ref, b1_ref, w2_ref, b2_ref, w3_ref, b3_ref, o_ref):
    # x_ref : (block_rows, 120)   8 pixels per lane-row, natural HBM order
    # w*_ref: 8-way block-diagonal weights, b*_ref: (1, lanes) tiled biases
    x = x_ref[...]
    h = jnp.dot(x, w1_ref[...], preferred_element_type=jnp.float32) + b1_ref[...]
    h = _elu(h)
    h = jnp.dot(h, w2_ref[...], preferred_element_type=jnp.float32) + b2_ref[...]
    h = _elu(h)
    z = jnp.dot(h, w3_ref[...], preferred_element_type=jnp.float32) + b3_ref[...]
    # Hand-rolled, numerically safe sigmoid (guaranteed Mosaic lowering).
    o_ref[...] = 1.0 / (1.0 + jnp.exp(-z))


def _pack_params(params):
    """Build the 8-way block-diagonal weights / tiled biases (tiny, done under jit)."""
    eye = jnp.eye(GROUP, dtype=jnp.float32)
    w1 = params["w1"].astype(jnp.float32)          # (16, 15)  torch Linear layout
    w2 = params["w2"].astype(jnp.float32)          # (16, 16)
    w3 = params["w3"].astype(jnp.float32)          # (3, 16)
    W1 = jnp.kron(eye, w1.T)                       # (120, 128)
    W2 = jnp.kron(eye, w2.T)                       # (128, 128)
    W3 = jnp.kron(eye, w3.T)                       # (128, 24)
    B1 = jnp.tile(params["b1"].astype(jnp.float32), GROUP)[None, :]   # (1, 128)
    B2 = jnp.tile(params["b2"].astype(jnp.float32), GROUP)[None, :]   # (1, 128)
    B3 = jnp.tile(params["b3"].astype(jnp.float32), GROUP)[None, :]   # (1, 24)
    return W1, B1, W2, B2, W3, B3


def _pick_block_rows(m, requested):
    """Sublane tile: number of 8-pixel lane-rows per grid step."""
    bt = min(requested, m)
    # For large inputs keep >= _MIN_GRID_STEPS steps so the software pipeline
    # has depth and the "parallel" axis can be split across v7x TensorCores.
    if m >= _MIN_GRID_STEPS * 128:
        bt = min(bt, pl.cdiv(m, _MIN_GRID_STEPS))
    if bt < m:
        bt = max(8, (bt // 8) * 8)     # sublane-aligned unless it is the full dim
    return bt


@functools.partial(jax.jit, static_argnames=("block_rows",))
def decoder_forward(x, params, *, block_rows=4096):
    """x: (N, 15) float32 -> (N, 3) float32.

    block_rows : lane-rows (8 pixels each) per grid step.  Per-step VMEM is
        roughly block_rows * 128 lanes * 4 B * (2 input bufs + 2 output bufs
        [the 24-lane output buffer pads to 128 lanes] + ~2 f32 h1/h2
        temporaries) ~= block_rows * 3 KiB, plus ~0.4 MiB of weights.
        block_rows=4096 -> ~13-16 MiB: under the 32 MiB default scoped VMEM
        limit and well under v7x's 64 MiB physical VMEM.  Cap around 8192 on
        v7x (or raise vmem_limit_bytes) before cranking it further.
    """
    N, d_in = x.shape
    if d_in != D_IN:
        raise ValueError(f"expected {D_IN} input features, got {d_in}")

    # Pad only to a multiple of one 8-pixel group (zeros; finite -> no NaNs).
    # For N % 8 == 0 this is a no-op; otherwise it is a single small pad copy.
    n_pad = pl.cdiv(N, GROUP) * GROUP
    if n_pad != N:
        x = jnp.pad(x, ((0, n_pad - N), (0, 0)))
    m = n_pad // GROUP

    # Free row-major view: (n_pad, 15) -> (m, 120).  No transpose anywhere.
    xg = x.astype(jnp.float32).reshape(m, LANES_IN)

    bt = _pick_block_rows(m, block_rows)
    grid = (pl.cdiv(m, bt),)            # partial last block handled by Pallas

    W1, B1, W2, B2, W3, B3 = _pack_params(params)

    def const2d(arr):                   # resident weights: fetched once
        return pl.BlockSpec(arr.shape, lambda i: (0, 0))

    flops = 2 * n_pad * (D_IN * D_H + D_H * D_H + D_H * D_OUT)
    transcendentals = n_pad * (2 * D_H + D_OUT)
    bytes_accessed = n_pad * 4 * (D_IN + D_OUT) + 4 * (
        W1.size + W2.size + W3.size + B1.size + B2.size + B3.size)

    out = pl.pallas_call(
        _decoder_kernel,
        out_shape=jax.ShapeDtypeStruct((m, LANES_OUT), jnp.float32),
        grid=grid,
        in_specs=[
            pl.BlockSpec((bt, LANES_IN), lambda i: (i, 0)),   # x tile
            const2d(W1), const2d(B1),
            const2d(W2), const2d(B2),
            const2d(W3), const2d(B3),
        ],
        out_specs=pl.BlockSpec((bt, LANES_OUT), lambda i: (i, 0)),
        compiler_params=pltpu.CompilerParams(
            dimension_semantics=("parallel",),
        ),
        cost_estimate=pl.CostEstimate(
            flops=flops,
            transcendentals=transcendentals,
            bytes_accessed=bytes_accessed,
        ),
    )(xg, W1, B1, W2, B2, W3, B3)

    # Free view back to natural layout, then strip the (<=7) padded rows.
    return out.reshape(n_pad, D_OUT)[:N]


def init_params(key, decoder_dim=1):
    """torch.nn.Linear-style init: weight (out, in), bias (out,), U(+-1/sqrt(fan_in))."""
    d_in = decoder_dim + 14
    dims = [(d_in, D_H), (D_H, D_H), (D_H, D_OUT)]
    params = {}
    for idx, (fi, fo) in enumerate(dims, start=1):
        key, kw, kb = jax.random.split(key, 3)
        bound = 1.0 / jnp.sqrt(fi)
        params[f"w{idx}"] = jax.random.uniform(
            kw, (fo, fi), jnp.float32, minval=-bound, maxval=bound)
        params[f"b{idx}"] = jax.random.uniform(
            kb, (fo,), jnp.float32, minval=-bound, maxval=bound)
    return params


def decoder_ref(x, params):
    """Pure-JAX float32 reference matching the PyTorch forward."""
    hp = jax.lax.Precision.HIGHEST
    h = _elu(jnp.dot(x, params["w1"].T, precision=hp) + params["b1"])
    h = _elu(jnp.dot(h, params["w2"].T, precision=hp) + params["b2"])
    z = jnp.dot(h, params["w3"].T, precision=hp) + params["b3"]
    return 1.0 / (1.0 + jnp.exp(-z))


if __name__ == "__main__":
    key = jax.random.PRNGKey(0)
    kx, kp = jax.random.split(key)

    # Small pixelwise batch.  N = 3001 exercises the row-pad (to 3008), a
    # multi-step grid (block_rows=128 -> 3 steps) and the partial last block.
    N = 3001
    x = jax.random.normal(kx, (N, D_IN), jnp.float32)
    params = init_params(kp, decoder_dim=1)

    out = decoder_forward(x, params, block_rows=128)
    out = jax.block_until_ready(out)
    assert out.shape == (N, D_OUT)

    ref = decoder_ref(x, params)
    max_err = float(jnp.max(jnp.abs(out - ref)))
    mean_err = float(jnp.mean(jnp.abs(out - ref)))
    # Kernel matmuls run at DEFAULT TPU precision (bf16 operands, f32 accum);
    # vs. a float32 reference the expected error on sigmoid outputs is a few
    # 1e-4 max / ~1e-4 mean.  Tolerances below catch any layout/weight bug
    # (which would produce O(0.1) errors) with a wide margin.
    assert max_err < 5e-3, f"max |err| vs reference too large: {max_err}"
    assert mean_err < 5e-4, f"mean |err| vs reference too large: {mean_err}"

    print("KERNEL_OK")
</pallas_src>

<mosaic_0001>
module attributes {stable_mosaic.version = 11 : i64} {
  func.func @_decoder_kernel(%arg0: i32, %arg1: memref<128x120xf32, #tpu.memory_space<vmem>>, %arg2: memref<120x128xf32, #tpu.memory_space<vmem>>, %arg3: memref<1x128xf32, #tpu.memory_space<vmem>>, %arg4: memref<128x128xf32, #tpu.memory_space<vmem>>, %arg5: memref<1x128xf32, #tpu.memory_space<vmem>>, %arg6: memref<128x24xf32, #tpu.memory_space<vmem>>, %arg7: memref<1x24xf32, #tpu.memory_space<vmem>>, %arg8: memref<128x24xf32, #tpu.memory_space<vmem>>) attributes {dimension_semantics = [#tpu.dimension_semantics<parallel>], iteration_bounds = array<i64: 3>, scalar_prefetch = 0 : i64, scratch_operands = 0 : i64, tpu.core_type = #tpu.core_type<tc>, window_params = [{transform_indices = @transform_0, window_bounds = array<i64: 128, 120>}, {pipeline_mode = #tpu.pipeline_mode<synchronous>, transform_indices = @transform_1, window_bounds = array<i64: 120, 128>}, {pipeline_mode = #tpu.pipeline_mode<synchronous>, transform_indices = @transform_2, window_bounds = array<i64: 1, 128>}, {pipeline_mode = #tpu.pipeline_mode<synchronous>, transform_indices = @transform_3, window_bounds = array<i64: 128, 128>}, {pipeline_mode = #tpu.pipeline_mode<synchronous>, transform_indices = @transform_4, window_bounds = array<i64: 1, 128>}, {pipeline_mode = #tpu.pipeline_mode<synchronous>, transform_indices = @transform_5, window_bounds = array<i64: 128, 24>}, {pipeline_mode = #tpu.pipeline_mode<synchronous>, transform_indices = @transform_6, window_bounds = array<i64: 1, 24>}, {transform_indices = @transform_7, window_bounds = array<i64: 128, 24>}]} {
    %c0 = arith.constant 0 : index
    %c0_0 = arith.constant 0 : index
    %0 = vector.load %arg1[%c0, %c0_0] : memref<128x120xf32, #tpu.memory_space<vmem>>, vector<128x120xf32>
    %c0_1 = arith.constant 0 : index
    %c0_2 = arith.constant 0 : index
    %1 = vector.load %arg2[%c0_1, %c0_2] : memref<120x128xf32, #tpu.memory_space<vmem>>, vector<120x128xf32>
    %cst = arith.constant dense<0.000000e+00> : vector<128x128xf32>
    %2 = tpu.matmul %0, %1, %cst {dimension_numbers = #tpu.dot_dimension_numbers<[1], [0], [0], [1], [0, 0, 1, 1], [], []>} : vector<128x120xf32>, vector<120x128xf32>, vector<128x128xf32> -> vector<128x128xf32>
    %c0_3 = arith.constant 0 : index
    %c0_4 = arith.constant 0 : index
    %3 = vector.load %arg3[%c0_3, %c0_4] : memref<1x128xf32, #tpu.memory_space<vmem>>, vector<1x128xf32>
    %4 = vector.broadcast %3 : vector<1x128xf32> to vector<128x128xf32>
    %5 = arith.addf %2, %4 : vector<128x128xf32>
    %cst_5 = arith.constant 0.000000e+00 : f32
    %6 = vector.broadcast %cst_5 : f32 to vector<128x128xf32>
    %7 = arith.cmpf ogt, %5, %6 : vector<128x128xf32>
    %8 = math.exp %5 : vector<128x128xf32>
    %cst_6 = arith.constant 1.000000e+00 : f32
    %9 = vector.broadcast %cst_6 : f32 to vector<128x128xf32>
    %10 = arith.subf %8, %9 : vector<128x128xf32>
    %11 = arith.select %7, %5, %10 : vector<128x128xi1>, vector<128x128xf32>
    %c0_7 = arith.constant 0 : index
    %c0_8 = arith.constant 0 : index
    %12 = vector.load %arg4[%c0_7, %c0_8] : memref<128x128xf32, #tpu.memory_space<vmem>>, vector<128x128xf32>
    %cst_9 = arith.constant dense<0.000000e+00> : vector<128x128xf32>
    %13 = tpu.matmul %11, %12, %cst_9 {dimension_numbers = #tpu.dot_dimension_numbers<[1], [0], [0], [1], [0, 0, 1, 1], [], []>} : vector<128x128xf32>, vector<128x128xf32>, vector<128x128xf32> -> vector<128x128xf32>
    %c0_10 = arith.constant 0 : index
    %c0_11 = arith.constant 0 : index
    %14 = vector.load %arg5[%c0_10, %c0_11] : memref<1x128xf32, #tpu.memory_space<vmem>>, vector<1x128xf32>
    %15 = vector.broadcast %14 : vector<1x128xf32> to vector<128x128xf32>
    %16 = arith.addf %13, %15 : vector<128x128xf32>
    %cst_12 = arith.constant 0.000000e+00 : f32
    %17 = vector.broadcast %cst_12 : f32 to vector<128x128xf32>
    %18 = arith.cmpf ogt, %16, %17 : vector<128x128xf32>
    %19 = math.exp %16 : vector<128x128xf32>
    %cst_13 = arith.constant 1.000000e+00 : f32
    %20 = vector.broadcast %cst_13 : f32 to vector<128x128xf32>
    %21 = arith.subf %19, %20 : vector<128x128xf32>
    %22 = arith.select %18, %16, %21 : vector<128x128xi1>, vector<128x128xf32>
    %c0_14 = arith.constant 0 : index
    %c0_15 = arith.constant 0 : index
    %23 = vector.load %arg6[%c0_14, %c0_15] : memref<128x24xf32, #tpu.memory_space<vmem>>, vector<128x24xf32>
    %cst_16 = arith.constant dense<0.000000e+00> : vector<128x24xf32>
    %24 = tpu.matmul %22, %23, %cst_16 {dimension_numbers = #tpu.dot_dimension_numbers<[1], [0], [0], [1], [0, 0, 1, 1], [], []>} : vector<128x128xf32>, vector<128x24xf32>, vector<128x24xf32> -> vector<128x24xf32>
    %c0_17 = arith.constant 0 : index
    %c0_18 = arith.constant 0 : index
    %25 = vector.load %arg7[%c0_17, %c0_18] : memref<1x24xf32, #tpu.memory_space<vmem>>, vector<1x24xf32>
    %26 = vector.broadcast %25 : vector<1x24xf32> to vector<128x24xf32>
    %27 = arith.addf %24, %26 : vector<128x24xf32>
    %cst_19 = arith.constant 0.000000e+00 : f32
    %28 = vector.broadcast %cst_19 : f32 to vector<128x24xf32>
    %29 = arith.subf %28, %27 : vector<128x24xf32>
    %30 = math.exp %29 : vector<128x24xf32>
    %cst_20 = arith.constant 1.000000e+00 : f32
    %31 = vector.broadcast %cst_20 : f32 to vector<128x24xf32>
    %32 = arith.addf %31, %30 : vector<128x24xf32>
    %cst_21 = arith.constant 1.000000e+00 : f32
    %33 = vector.broadcast %cst_21 : f32 to vector<128x24xf32>
    %34 = arith.divf %33, %32 : vector<128x24xf32>
    %c0_22 = arith.constant 0 : index
    %c0_23 = arith.constant 0 : index
    %35 = vector.load %arg8[%c0_22, %c0_23] : memref<128x24xf32, #tpu.memory_space<vmem>>, vector<128x24xf32>
    tpu.vector_store %arg8[%c0_22, %c0_23], %34 {strides = array<i32>} : memref<128x24xf32, #tpu.memory_space<vmem>>, vector<128x24xf32>,
    return
  }
  func.func @transform_0(%arg0: i32) -> (i32, i32) {
    %c0_i32 = arith.constant 0 : i32
    %c0_i32_0 = arith.constant 0 : i32
    return %arg0, %c0_i32 : i32, i32
  }
  func.func @transform_1(%arg0: i32) -> (i32, i32) {
    %c0_i32 = arith.constant 0 : i32
    %c0_i32_0 = arith.constant 0 : i32
    %c0_i32_1 = arith.constant 0 : i32
    return %c0_i32, %c0_i32_0 : i32, i32
  }
  func.func @transform_2(%arg0: i32) -> (i32, i32) {
    %c0_i32 = arith.constant 0 : i32
    %c0_i32_0 = arith.constant 0 : i32
    %c0_i32_1 = arith.constant 0 : i32
    return %c0_i32, %c0_i32_0 : i32, i32
  }
  func.func @transform_3(%arg0: i32) -> (i32, i32) {
    %c0_i32 = arith.constant 0 : i32
    %c0_i32_0 = arith.constant 0 : i32
    %c0_i32_1 = arith.constant 0 : i32
    return %c0_i32, %c0_i32_0 : i32, i32
  }
  func.func @transform_4(%arg0: i32) -> (i32, i32) {
    %c0_i32 = arith.constant 0 : i32
    %c0_i32_0 = arith.constant 0 : i32
    %c0_i32_1 = arith.constant 0 : i32
    return %c0_i32, %c0_i32_0 : i32, i32
  }
  func.func @transform_5(%arg0: i32) -> (i32, i32) {
    %c0_i32 = arith.constant 0 : i32
    %c0_i32_0 = arith.constant 0 : i32
    %c0_i32_1 = arith.constant 0 : i32
    return %c0_i32, %c0_i32_0 : i32, i32
  }
  func.func @transform_6(%arg0: i32) -> (i32, i32) {
    %c0_i32 = arith.constant 0 : i32
    %c0_i32_0 = arith.constant 0 : i32
    %c0_i32_1 = arith.constant 0 : i32
    return %c0_i32, %c0_i32_0 : i32, i32
  }
  func.func @transform_7(%arg0: i32) -> (i32, i32) {
    %c0_i32 = arith.constant 0 : i32
    %c0_i32_0 = arith.constant 0 : i32
    return %arg0, %c0_i32 : i32, i32
  }
}

</mosaic_0001>

<bundles_post_ra>
// kernel: tile.18
= control target key start
LH: loop header
LB: loop body
LE: loop exit
PB: predicated region body
PF: predicated region fallthrough
CT: control target
= control target key end

     0   :  { %s22_s0 = inlined_call_operand.vmem [shape: f32[16], index: 0, kind: input, shape index: {}]   ;;  %s23_s1 = inlined_call_operand.vmem [shape: f32[8,16], index: 1, kind: output, shape index: {}]  }
   0x1   :  { %v4_v0 = vld [vmem:[%s22_s0] ss:$0 sm:$0xff] }
   0x2   :  { %5 = vst [vmem:[%s23_s1] sm:$0xff] %v4_v0 }

// kernel: tile.19
= control target key start
LH: loop header
LB: loop body
LE: loop exit
PB: predicated region body
PF: predicated region fallthrough
CT: control target
= control target key end

     0   :  { %s67_s10 = smov 112   ;;  %s68_s11 = smov 80   ;;  %vm3_vm0 = vcmask 130048   ;;  %vm9_vm1 = vcmask 1048448   ;;  %vm15_vm2 = vcmask 917248   ;;  %vm21_vm3 = vcmask 786048   ;;  %s111_s0 = inlined_call_operand.vmem [shape: f32[8,16], index: 0, kind: input, shape index: {}]   ;;  %s112_s1 = inlined_call_operand.vmem [shape: f32[1,128], index: 1, kind: output, shape index: {}]  }
   0x1   :  { %v53_v0 = vld [vmem:[%s111_s0 + $0x7] sm:$0x1]   ;;  %v55_v1 = vld [vmem:[%s111_s0 + $0x5] sm:$0x1]   ;;  %v54_v2 = vld [vmem:[%s111_s0 + $0x6] sm:$0x1]  }
   0x2   :  { %7 = vrot.lane.b32.xlu0 %v53_v0, %s67_s10  ;;  %19 = vrot.lane.b32.xlu1 %v55_v1, %s68_s11  ;;  %v56_v3 = vld [vmem:[%s111_s0 + $0x4] sm:$0x1]   ;;  %v2_v4 = vld [vmem:[%s111_s0] sm:$0x1]   ;;  %s69_s18 = smov 96   ;;  %s70_s19 = smov 64  }
   0x3   :  { %4 = vst.msk [vmem:[#allocation0] sm:$0x1] %vm3_vm0, %v2_v4   ;;  %v57_v5 = vld [vmem:[%s111_s0 + $0x3] sm:$0x1]   ;;  %v58_v6 = vld [vmem:[%s111_s0 + $0x2] sm:$0x1]  }
   0x4   :  { %s71_s24 = smov 48   ;;  %s72_s25 = smov 32   ;;  %v59_v7 = vld [vmem:[%s111_s0 + $0x1] sm:$0x1]   ;;  %vm27_vm4 = vcmask 654848   ;;  %vm33_vm5 = vcmask 523648  }
   0x5   :  { %s73_s0 = smov 16   ;;  %vm39_vm6 = vcmask 392448   ;;  %vm45_vm7 = vcmask 261248  }
   0x6   :  { %13 = vrot.lane.b32.xlu0 %v54_v2, %s69_s18  ;;  %25 = vrot.lane.b32.xlu1 %v56_v3, %s70_s19 }
   0xa   :  { %31 = vrot.lane.b32.xlu0 %v57_v5, %s71_s24  ;;  %37 = vrot.lane.b32.xlu1 %v58_v6, %s72_s25 }
   0xe   :  { %43 = vrot.lane.b32.xlu0 %v59_v7, %s73_s0 }
  0x74   :  { %v8_v8 = vpop.permute.xlu0 %7   ;;  %v20_v9 = vpop.permute.xlu1 %19  }
  0x75   :  { %10 = vst.msk [vmem:[#allocation0] sm:$0x1] %vm9_vm1, %v8_v8  }
  0x78   :  { %v14_v10 = vpop.permute.xlu0 %13   ;;  %v26_v11 = vpop.permute.xlu1 %25  }
  0x79   :  { %16 = vst.msk [vmem:[#allocation0] sm:$0x1] %vm15_vm2, %v14_v10  }
  0x7a   :  { %22 = vst.msk [vmem:[#allocation0] sm:$0x1] %vm21_vm3, %v20_v9  }
  0x7b   :  { %28 = vst.msk [vmem:[#allocation0] sm:$0x1] %vm27_vm4, %v26_v11  }
  0x7c   :  { %v32_v12 = vpop.permute.xlu0 %31   ;;  %v38_v13 = vpop.permute.xlu1 %37  }
  0x7d   :  { %34 = vst.msk [vmem:[#allocation0] sm:$0x1] %vm33_vm5, %v32_v12  }
  0x7e   :  { %40 = vst.msk [vmem:[#allocation0] sm:$0x1] %vm39_vm6, %v38_v13  }
  0x80   :  { %v44_v14 = vpop.permute.xlu0 %43  }
  0x81   :  { %46 = vst.msk [vmem:[#allocation0] sm:$0x1] %vm45_vm7, %v44_v14  }
  0x88   :  { %v50_v15 = vld [vmem:[#allocation0] sm:$0x1] }
  0x89   :  { %52 = vst [vmem:[%s112_s1] sm:$0x1] %v50_v15 }

// kernel: tile.28
= control target key start
LH: loop header
LB: loop body
LE: loop exit
PB: predicated region body
PF: predicated region fallthrough
CT: control target
= control target key end

     0   :  { %s22_s0 = inlined_call_operand.vmem [shape: f32[3], index: 0, kind: input, shape index: {}]   ;;  %s23_s1 = inlined_call_operand.vmem [shape: f32[8,3], index: 1, kind: output, shape index: {}]  }
   0x1   :  { %v4_v0 = vld [vmem:[%s22_s0] ss:$0 sm:$0xff] }
   0x2   :  { %5 = vst [vmem:[%s23_s1] sm:$0xff] %v4_v0 }

// kernel: tile.29
= control target key start
LH: loop header
LB: loop body
LE: loop exit
PB: predicated region body
PF: predicated region fallthrough
CT: control target
= control target key end

     0   :  { %s67_s10 = smov 21   ;;  %s68_s11 = smov 15   ;;  %vm3_vm0 = vcmask 23552   ;;  %vm9_vm1 = vcmask 195752   ;;  %vm15_vm2 = vcmask 171152   ;;  %vm21_vm3 = vcmask 146552   ;;  %s111_s0 = inlined_call_operand.vmem [shape: f32[8,3], index: 0, kind: input, shape index: {}]   ;;  %s112_s1 = inlined_call_operand.vmem [shape: f32[1,24], index: 1, kind: output, shape index: {}]  }
   0x1   :  { %v53_v0 = vld [vmem:[%s111_s0 + $0x7] sm:$0x1]   ;;  %v55_v1 = vld [vmem:[%s111_s0 + $0x5] sm:$0x1]   ;;  %v54_v2 = vld [vmem:[%s111_s0 + $0x6] sm:$0x1]  }
   0x2   :  { %7 = vrot.lane.b32.xlu0 %v53_v0, %s67_s10  ;;  %19 = vrot.lane.b32.xlu1 %v55_v1, %s68_s11  ;;  %v56_v3 = vld [vmem:[%s111_s0 + $0x4] sm:$0x1]   ;;  %v2_v4 = vld [vmem:[%s111_s0] sm:$0x1]   ;;  %s69_s18 = smov 18   ;;  %s70_s19 = smov 12  }
   0x3   :  { %4 = vst.msk [vmem:[#allocation0] sm:$0x1] %vm3_vm0, %v2_v4   ;;  %v57_v5 = vld [vmem:[%s111_s0 + $0x3] sm:$0x1]   ;;  %v58_v6 = vld [vmem:[%s111_s0 + $0x2] sm:$0x1]  }
   0x4   :  { %s71_s24 = smov 9   ;;  %s72_s25 = smov 6   ;;  %v59_v7 = vld [vmem:[%s111_s0 + $0x1] sm:$0x1]   ;;  %vm27_vm4 = vcmask 121952   ;;  %vm33_vm5 = vcmask 97352  }
   0x5   :  { %s73_s0 = smov 3   ;;  %vm39_vm6 = vcmask 72752   ;;  %vm45_vm7 = vcmask 48152  }
   0x6   :  { %13 = vrot.lane.b32.xlu0 %v54_v2, %s69_s18  ;;  %25 = vrot.lane.b32.xlu1 %v56_v3, %s70_s19 }
   0xa   :  { %31 = vrot.lane.b32.xlu0 %v57_v5, %s71_s24  ;;  %37 = vrot.lane.b32.xlu1 %v58_v6, %s72_s25 }
   0xe   :  { %43 = vrot.lane.b32.xlu0 %v59_v7, %s73_s0 }
  0x74   :  { %v8_v8 = vpop.permute.xlu0 %7   ;;  %v20_v9 = vpop.permute.xlu1 %19  }
  0x75   :  { %10 = vst.msk [vmem:[#allocation0] sm:$0x1] %vm9_vm1, %v8_v8  }
  0x78   :  { %v14_v10 = vpop.permute.xlu0 %13   ;;  %v26_v11 = vpop.permute.xlu1 %25  }
  0x79   :  { %16 = vst.msk [vmem:[#allocation0] sm:$0x1] %vm15_vm2, %v14_v10  }
  0x7a   :  { %22 = vst.msk [vmem:[#allocation0] sm:$0x1] %vm21_vm3, %v20_v9  }
  0x7b   :  { %28 = vst.msk [vmem:[#allocation0] sm:$0x1] %vm27_vm4, %v26_v11  }
  0x7c   :  { %v32_v12 = vpop.permute.xlu0 %31   ;;  %v38_v13 = vpop.permute.xlu1 %37  }
  0x7d   :  { %34 = vst.msk [vmem:[#allocation0] sm:$0x1] %vm33_vm5, %v32_v12  }
  0x7e   :  { %40 = vst.msk [vmem:[#allocation0] sm:$0x1] %vm39_vm6, %v38_v13  }
  0x80   :  { %v44_v14 = vpop.permute.xlu0 %43  }
  0x81   :  { %46 = vst.msk [vmem:[#allocation0] sm:$0x1] %vm45_vm7, %v44_v14  }
  0x88   :  { %v50_v15 = vld [vmem:[#allocation0] sm:$0x1] }
  0x89   :  { %52 = vst [vmem:[%s112_s1] sm:$0x1] %v50_v15 }

// kernel: decoder_forward.1
= control target key start
LH: loop header
LB: loop body
LE: loop exit
PB: predicated region body
PF: predicated region fallthrough
CT: control target
= control target key end

     0   :  { %s2207_s24 = smov 0   ;;  %s2209_s25 = smov 0   ;;  %s2720_s0 = inlined_call_operand.vmem [shape: f32[376,120], index: 0, kind: input, shape index: {}]   ;;  %s2721_s1 = inlined_call_operand.vmem [shape: f32[120,128], index: 1, kind: input, shape index: {}]   ;;  %s2722_s2 = inlined_call_operand.vmem [shape: f32[1,128], index: 2, kind: input, shape index: {}]   ;;  %s2723_s3 = inlined_call_operand.vmem [shape: f32[128,128], index: 3, kind: input, shape index: {}]   ;;  %s2724_s4 = inlined_call_operand.vmem [shape: f32[1,128], index: 4, kind: input, shape index: {}]   ;;  %s2725_s5 = inlined_call_operand.vmem [shape: f32[128,24], index: 5, kind: input, shape index: {}]   ;;  %s2726_s6 = inlined_call_operand.vmem [shape: f32[1,24], index: 6, kind: input, shape index: {}]   ;;  %s2727_s7 = inlined_call_operand.vmem [shape: f32[376,24], index: 7, kind: output, shape index: {}]  }
   0x1   :  { %s2211_s26 = smov 0  }
   0x2 LB: > { %s2220_s27 = sadd.s32 4294967295, %s2133_s26   ;;  %s2222_s28 = sadd.s32 1, %s2133_s26   ;;  %s2133_s26 = sphi %s2211_s26, %s2734_s26   ;;  %s2129_s25 = sphi %s2209_s25, %s2733_s25   ;;  %s2125_s24 = sphi %s2207_s24, %s2732_s24  }
   0x3   : > { %s173_s29 = ssub.s32 %s2133_s26, %s2222_s28  ;;  %s176_s30 = sadd.s32 1, %s2129_s25 }
   0x4   : > { %p174_p0 = scmp.eq.s32.totalorder %s173_s29, 0  ;;  %p186_p1 = scmp.ne.s32.totalorder %s2129_s25, %s2125_s24 }
   0x5   : > { %p187_p2 = scmp.eq.s32.totalorder %s2220_s27, 2  ;;  %p1419_p3 = scmp.ge.s32.totalorder %s2133_s26, 1 }
   0x6   : > { %s2230_s8 = scalar_select %p174_p0, %s2129_s25, %s176_s30  }
   0x7   : > { %p2232_p4 = por %p187_p2, %p186_p1  ;;  %p246_p5 = scmp.lt.s32.totalorder %s2133_s26, 4 }
   0x9   : > { %p247_p6 = pnand %p1419_p3, %p246_p5 }
   0xa   : > { %v316_v0 = vld [vmem:[%s2721_s1] sm:$0xff] (!%p247_p6)  ;;  %v317_v1 = vld [vmem:[%s2721_s1 + $0x8] sm:$0xff] (!%p247_p6)  ;;  %v318_v2 = vld [vmem:[%s2721_s1 + $0x10] sm:$0xff] (!%p247_p6)  ;;  %s2246_s16 = sshll.u32 (!%p247_p6), %s2220_s27, 4  ;;  %vm338_vm0 = vcmask (!%p247_p6), 982016   ;;  %s278_s20 = sand.u32 (!%p247_p6), 1, %s2125_s24  }
   0xb   : > { %250 = sbr.rel (%p247_p6) target bundleno = 830 (0x33e), region = 48  ;;  %v1755_v3 = vpack.c.bf16 (!%p247_p6), %v317_v1, %v316_v0  ;;  %v319_v4 = vld [vmem:[%s2721_s1 + $0x18] sm:$0xff] (!%p247_p6)  ;;  %p286_p7 = scmp.lt.s32.totalorder (!%p247_p6), %s2246_s16, 46  ;;  %v320_v6 = vld [vmem:[%s2721_s1 + $0x20] sm:$0xff] (!%p247_p6)  ;;  %v321_v7 = vld [vmem:[%s2721_s1 + $0x28] sm:$0xff] (!%p247_p6) }
   0xc   : > { %v1759_v5 = vpack.c.bf16 (!%p247_p6), %v319_v4, %v318_v2  ;;  %v1763_v8 = vpack.c.bf16 (!%p247_p6), %v321_v7, %v320_v6  ;;  %v612_v9 = vld [vmem:[%s2723_s3] sm:$0xff] (!%p247_p6)  ;;  %v613_v10 = vld [vmem:[%s2723_s3 + $0x8] sm:$0xff] (!%p247_p6)  ;;  %v614_v11 = vld [vmem:[%s2723_s3 + $0x10] sm:$0xff] (!%p247_p6)  ;;  %s1420_s22 = sshll.u32 (!%p247_p6), %s278_s20, 7 }
   0xd   : > { %1756 = vmatprep.subr.bf16.mxu0 (!%p247_p6), %v1755_v3  ;;  %v322_v12 = vld [vmem:[%s2721_s1 + $0x30] sm:$0xff] (!%p247_p6)  ;;  %v323_v13 = vld [vmem:[%s2721_s1 + $0x38] sm:$0xff] (!%p247_p6)  ;;  %v1783_v14 = vpack.c.bf16 (!%p247_p6), %v613_v10, %v612_v9  ;;  %v616_v18 = vld [vmem:[%s2723_s3 + $0x20] sm:$0xff] (!%p247_p6)  ;;  %s2586_s24 = scalar_lea.vmem (!%p247_p6), [#allocation2], %s1420_s22  }
   0xe   : > { %1758 = vmatpush3.bf16.msra.mxu0 (!%p247_p6), %v1755_v3  ;;  %v615_v15 = vld [vmem:[%s2723_s3 + $0x18] sm:$0xff] (!%p247_p6)  ;;  %v617_v19 = vld [vmem:[%s2723_s3 + $0x28] sm:$0xff] (!%p247_p6)  ;;  %v1767_v20 = vpack.c.bf16 (!%p247_p6), %v323_v13, %v322_v12  ;;  %v324_v21 = vld [vmem:[%s2721_s1 + $0x40] sm:$0xff] (!%p247_p6) }
   0xf   : > { %1760 = vmatprep.subr.bf16.mxu0 (!%p247_p6), %v1759_v5  ;;  %v1787_v17 = vpack.c.bf16 (!%p247_p6), %v615_v15, %v614_v11  ;;  %1784 = vmatprep.subr.bf16.mxu1 (!%p247_p6), %v1783_v14  ;;  %v325_v22 = vld [vmem:[%s2721_s1 + $0x48] sm:$0xff] (!%p247_p6)  ;;  %v1791_v23 = vpack.c.bf16 (!%p247_p6), %v617_v19, %v616_v18  ;;  %v326_v25 = vld [vmem:[%s2721_s1 + $0x50] sm:$0xff] (!%p247_p6)  ;;  %v327_v26 = vld [vmem:[%s2721_s1 + $0x58] sm:$0xff] (!%p247_p6) }
  0x10   : > { %1786 = vmatpush3.bf16.msra.mxu1 (!%p247_p6), %v1783_v14  ;;  %v1771_v24 = vpack.c.bf16 (!%p247_p6), %v325_v22, %v324_v21  ;;  %v1775_v27 = vpack.c.bf16 (!%p247_p6), %v327_v26, %v326_v25  ;;  %v328_v28 = vld [vmem:[%s2721_s1 + $0x60] sm:$0xff] (!%p247_p6)  ;;  %v329_v29 = vld [vmem:[%s2721_s1 + $0x68] sm:$0xff] (!%p247_p6)  ;;  %v330_v31 = vld [vmem:[%s2721_s1 + $0x70] sm:$0xff] (!%p247_p6) }
  0x11   : > { %1788 = vmatprep.subr.bf16.mxu1 (!%p247_p6), %v1787_v17  ;;  %v1779_v30 = vpack.c.bf16 (!%p247_p6), %v329_v29, %v328_v28  ;;  %v618_v47 = vld [vmem:[%s2723_s3 + $0x30] sm:$0xff] (!%p247_p6)  ;;  %v619_v48 = vld [vmem:[%s2723_s3 + $0x38] sm:$0xff] (!%p247_p6)  ;;  %v620_v50 = vld [vmem:[%s2723_s3 + $0x40] sm:$0xff] (!%p247_p6) }
  0x12   : > { %s287_s23 = scalar_select %p286_p7, %s2246_s16, 46  ;;  %1762 = vmatpush3.bf16.msra.mxu0 %v1759_v5  ;;  %v1795_v49 = vpack.c.bf16 %v619_v48, %v618_v47  ;;  %v621_v51 = vld [vmem:[%s2723_s3 + $0x48] sm:$0xff]  ;;  %v622_v53 = vld [vmem:[%s2723_s3 + $0x50] sm:$0xff]  ;;  %v623_v54 = vld [vmem:[%s2723_s3 + $0x58] sm:$0xff] }
  0x13   : > { %1764 = vmatprep.subr.bf16.mxu0 %v1763_v8  ;;  %v1799_v52 = vpack.c.bf16 %v621_v51, %v620_v50  ;;  %v1803_v55 = vpack.c.bf16 %v623_v54, %v622_v53  ;;  %v624_v56 = vld [vmem:[%s2723_s3 + $0x60] sm:$0xff]  ;;  %v625_v57 = vld [vmem:[%s2723_s3 + $0x68] sm:$0xff]  ;;  %v626_v59 = vld [vmem:[%s2723_s3 + $0x70] sm:$0xff]  ;;  %s1491_s29 = sshll.u32 (%p2232_p4), %s2220_s27, 7 }
  0x14   : > { %s1422_s26 = sshll.u32 %s287_s23, 3  ;;  %1790 = vmatpush3.bf16.msra.mxu1 %v1787_v17  ;;  %v1807_v58 = vpack.c.bf16 %v625_v57, %v624_v56  ;;  %v627_v60 = vld [vmem:[%s2723_s3 + $0x78] sm:$0xff]  ;;  %v860_v62 = vld [vmem:[%s2725_s5] sm:$0xff]  ;;  %v861_v63 = vld [vmem:[%s2725_s5 + $0x8] sm:$0xff]  ;;  %s1149_s23 = ssub.s32 (%p2232_p4), 47, %s2246_s16 }
  0x15   : > { %s2277_s21 = scalar_lea.vmem %s2720_s0, %s1422_s26  ;;  %1792 = vmatprep.subr.bf16.mxu1 %v1791_v23  ;;  %v1811_v61 = vpack.c.bf16 %v627_v60, %v626_v59  ;;  %v862_v0 = vld [vmem:[%s2725_s5 + $0x10] sm:$0xff]  ;;  %v2380_v1 = vpack.c.bf16 %v861_v63, %v860_v62  ;;  %v863_v2 = vld [vmem:[%s2725_s5 + $0x18] sm:$0xff]  ;;  %v864_v4 = vld [vmem:[%s2725_s5 + $0x20] sm:$0xff]  ;;  %p1150_p8 = scmp.lt.s32.totalorder (%p2232_p4), %s1149_s23, 16 }
  0x16   : > { %v300_v16 = vld [vmem:[%s2277_s21] sm:$0xff]  ;;  %1766 = vmatpush3.bf16.msra.mxu0 %v1763_v8  ;;  %v301_v32 = vld [vmem:[%s2277_s21 + $0x8] sm:$0xff]  ;;  %v302_v33 = vld [vmem:[%s2277_s21 + $0x10] sm:$0xff]  ;;  %v2385_v3 = vpack.c.bf16 %v863_v2, %v862_v0  ;;  %s2627_s11 = scalar_lea.vmem (%p2232_p4), %s2727_s7, %s1491_s29  }
  0x17   : > { %1619 = vmatprep.mubr.msk.f32.mxu0 %vm338_vm0, %v300_v16  ;;  %1768 = vmatprep.subr.bf16.mxu0 %v1767_v20  ;;  %v303_v34 = vld [vmem:[%s2277_s21 + $0x18] sm:$0xff]  ;;  %v304_v35 = vld [vmem:[%s2277_s21 + $0x20] sm:$0xff]  ;;  %v305_v36 = vld [vmem:[%s2277_s21 + $0x28] sm:$0xff] }
  0x18   : > { %1794 = vmatpush3.bf16.msra.mxu1 %v1791_v23  ;;  %v306_v37 = vld [vmem:[%s2277_s21 + $0x30] sm:$0xff]  ;;  %v307_v38 = vld [vmem:[%s2277_s21 + $0x38] sm:$0xff]  ;;  %v308_v39 = vld [vmem:[%s2277_s21 + $0x40] sm:$0xff] }
  0x19   : > { %v309_v40 = vld [vmem:[%s2277_s21 + $0x48] sm:$0xff]  ;;  %v310_v41 = vld [vmem:[%s2277_s21 + $0x50] sm:$0xff]  ;;  %v311_v42 = vld [vmem:[%s2277_s21 + $0x58] sm:$0xff]  ;;  %1796 = vmatprep.subr.bf16.mxu1 %v1795_v49 }
  0x1a   : > { %1770 = vmatpush3.bf16.msra.mxu0 %v1767_v20  ;;  %v312_v43 = vld [vmem:[%s2277_s21 + $0x60] sm:$0xff]  ;;  %v313_v44 = vld [vmem:[%s2277_s21 + $0x68] sm:$0xff]  ;;  %v314_v45 = vld [vmem:[%s2277_s21 + $0x70] sm:$0xff] }
  0x1b   : > { %1772 = vmatprep.subr.bf16.mxu0 %v1771_v24  ;;  %v315_v46 = vld [vmem:[%s2277_s21 + $0x78] sm:$0xff]  ;;  %v865_v5 = vld [vmem:[%s2725_s5 + $0x28] sm:$0xff]  ;;  %v2405_v7 = vld [vmem:[%s2722_s2] ss:$0 sm:$0xff] }
  0x1c   : > { %1798 = vmatpush3.bf16.msra.mxu1 %v1795_v49  ;;  %v2397_v6 = vpack.c.bf16 %v865_v5, %v864_v4 }
  0x1d   : > { %1800 = vmatprep.subr.bf16.mxu1 %v1799_v52 }
  0x1e   : > { %1774 = vmatpush3.bf16.msra.mxu0 %v1771_v24 }
  0x1f   : > { %1776 = vmatprep.subr.bf16.mxu0 %v1775_v27 }
  0x20   : > { %1802 = vmatpush3.bf16.msra.mxu1 %v1799_v52 }
  0x21   : > { %1804 = vmatprep.subr.bf16.mxu1 %v1803_v55 }
  0x22   : > { %1778 = vmatpush3.bf16.msra.mxu0 %v1775_v27 }
  0x23   : > { %1780 = vmatprep.subr.bf16.mxu0 %v1779_v30 }
  0x24   : > { %1806 = vmatpush3.bf16.msra.mxu1 %v1803_v55 }
  0x25   : > { %1808 = vmatprep.subr.bf16.mxu1 %v1807_v58 }
  0x26   : > { %1782 = vmatpush3.bf16.msra.mxu0 %v1779_v30 }
  0x27   : > { %1617 = vmatprep.subr.mxu0 %v330_v31 }
  0x28   : > { %1810 = vmatpush3.bf16.msra.mxu1 %v1807_v58 }
  0x29   : > { %1812 = vmatprep.subr.bf16.mxu1 %v1811_v61 }
  0x2a   : > { %1618 = vmatpush3.msra.mxu0 %v330_v31 }
  0x2b   : > { %1620 = vmatmul.mubr.msk.f32.vlgmr.msra.gmra.mrb[0].mxu0 %vm338_vm0, %v301_v32  ;;  %1816 = vmatprep.subr.bf16.mxu0 %v2380_v1 }
  0x2c   : > { %1622 = vmatprep.mubr.msk.f32.mxu0 %vm338_vm0, %v302_v33  ;;  %1814 = vmatpush3.bf16.msra.mxu1 %v1811_v61 }
  0x2d   : > { %1847 = vmatprep.subr.bf16.mxu1 %v2380_v1  ;;  %1818 = vmatpush3.bf16.msra.mxu0 %v2380_v1 }
  0x2e   : > { %1820 = vmatprep.subr.bf16.mxu0 %v2385_v3 }
  0x2f   : > { %1623 = vmatmul.mubr.msk.f32.gmra.mrb[2].mxu0 %vm338_vm0, %v303_v34 }
  0x30   : > { %1625 = vmatprep.mubr.msk.f32.mxu0 %vm338_vm0, %v304_v35 }
  0x31   : > { %1822 = vmatpush3.bf16.msra.mxu0 %v2385_v3 }
  0x32   : > { %1824 = vmatprep.subr.bf16.mxu0 %v2397_v6 }
  0x33   : > { %1626 = vmatmul.mubr.msk.f32.gmra.mrb[4].mxu0 %vm338_vm0, %v305_v36 }
  0x34   : > { %1628 = vmatprep.mubr.msk.f32.mxu0 %vm338_vm0, %v306_v37 }
  0x35   : > { %1826 = vmatpush3.bf16.msra.mxu0 %v2397_v6 }
  0x37   : > { %1629 = vmatmul.mubr.msk.f32.gmra.mrb[6].mxu0 %vm338_vm0, %v307_v38 }
  0x38   : > { %1631 = vmatprep.mubr.msk.f32.mxu0 %vm338_vm0, %v308_v39 }
  0x3b   : > { %1632 = vmatmul.mubr.msk.f32.gmra.mrb[8].mxu0 %vm338_vm0, %v309_v40 }
  0x3c   : > { %1634 = vmatprep.mubr.msk.f32.mxu0 %vm338_vm0, %v310_v41 }
  0x3f   : > { %1635 = vmatmul.mubr.msk.f32.gmra.mrb[10].mxu0 %vm338_vm0, %v311_v42 }
  0x40   : > { %1637 = vmatprep.mubr.msk.f32.mxu0 %vm338_vm0, %v312_v43 }
  0x43   : > { %1638 = vmatmul.mubr.msk.f32.gmra.mrb[12].mxu0 %vm338_vm0, %v313_v44 }
  0x44   : > { %1640 = vmatprep.mubr.msk.f32.mxu0 %vm338_vm0, %v314_v45 }
  0x47   : > { %1641 = vmatmul.mubr.msk.f32.gmra.mrb[14].mxu0 %vm338_vm0, %v315_v46 }
  0xfe   : > { %v1621_v8 = vpop.f32.mrb[0].mxu0 }
  0xff   : > { %v459_v9 = vadd.f32 %v1621_v8, %v2405_v7  ;;  %v453_v10 = vpop.f32.mrb[1].mxu0 }
 0x100   : > { %v454_v11 = vadd.f32 %v2405_v7, %v453_v10 }
 0x101   : > { %v550_v12 = vmul.f32 1.442695, %v459_v9  ;;  %vm533_vm2 = vcmp.gt.f32.partialorder %v459_v9, 0.0 }
 0x102   : > { %v548_v13 = vmul.f32 1.442695, %v454_v11  ;;  %v1624_v14 = vpop.f32.mrb[2].mxu0  ;;  %vm532_vm1 = vcmp.gt.f32.partialorder %v454_v11, 0.0 }
 0x103   : > { %1951 = vpow2.f32 %v550_v12  ;;  %v469_v15 = vadd.f32 %v1624_v14, %v2405_v7  ;;  %v463_v16 = vpop.f32.mrb[3].mxu0 }
 0x104   : > { %1953 = vpow2.f32 %v548_v13  ;;  %v464_v17 = vadd.f32 %v2405_v7, %v463_v16 }
 0x105   : > { %v554_v18 = vmul.f32 1.442695, %v469_v15  ;;  %vm535_vm4 = vcmp.gt.f32.partialorder %v469_v15, 0.0 }
 0x106   : > { %v552_v19 = vmul.f32 1.442695, %v464_v17  ;;  %v1627_v20 = vpop.f32.mrb[4].mxu0  ;;  %vm534_vm3 = vcmp.gt.f32.partialorder %v464_v17, 0.0 }
 0x107   : > { %1955 = vpow2.f32 %v554_v18  ;;  %v2412_v21 = vadd.f32 %v1627_v20, %v2405_v7  ;;  %v473_v22 = vpop.f32.mrb[5].mxu0 }
 0x108   : > { %1957 = vpow2.f32 %v552_v19  ;;  %v2415_v23 = vadd.f32 %v2405_v7, %v473_v22 }
 0x109   : > { %v558_v24 = vmul.f32 1.442695, %v2412_v21  ;;  %vm537_vm6 = vcmp.gt.f32.partialorder %v2412_v21, 0.0 }
 0x10a   : > { %v556_v25 = vmul.f32 1.442695, %v2415_v23  ;;  %v1630_v26 = vpop.f32.mrb[6].mxu0  ;;  %vm536_vm5 = vcmp.gt.f32.partialorder %v2415_v23, 0.0 }
 0x10b   : > { %1959 = vpow2.f32 %v558_v24  ;;  %v2420_v27 = vadd.f32 %v1630_v26, %v2405_v7  ;;  %v483_v28 = vpop.f32.mrb[7].mxu0 }
 0x10c   : > { %1961 = vpow2.f32 %v556_v25  ;;  %v2423_v29 = vadd.f32 %v2405_v7, %v483_v28 }
 0x10d   : > { %v1952_v30 = vpop.eup %1951  ;;  %v562_v31 = vmul.f32 1.442695, %v2420_v27  ;;  %vm539_vm8 = vcmp.gt.f32.partialorder %v2420_v27, 0.0 }
 0x10e   : > { %v1954_v32 = vpop.eup %1953  ;;  %v560_v33 = vmul.f32 1.442695, %v2423_v29  ;;  %v1633_v34 = vpop.f32.mrb[8].mxu0  ;;  %v1441_v35 = vadd.f32 -1.0, %v1952_v30  ;;  %vm538_vm7 = vcmp.gt.f32.partialorder %v2423_v29, 0.0 }
 0x10f   : > { %1963 = vpow2.f32 %v562_v31  ;;  %v2428_v36 = vadd.f32 %v1633_v34, %v2405_v7  ;;  %v493_v37 = vpop.f32.mrb[9].mxu0  ;;  %v1440_v38 = vadd.f32 -1.0, %v1954_v32 }
 0x110   : > { %1965 = vpow2.f32 %v560_v33  ;;  %v2431_v39 = vadd.f32 %v2405_v7, %v493_v37  ;;  %v597_v46 = vsel %vm533_vm2, %v459_v9, %v1441_v35 }
 0x111   : > { %v1956_v40 = vpop.eup %1955  ;;  %v566_v41 = vmul.f32 1.442695, %v2428_v36  ;;  %v596_v42 = vsel %vm532_vm1, %v454_v11, %v1440_v38  ;;  %vm541_vm10 = vcmp.gt.f32.partialorder %v2428_v36, 0.0 }
 0x112   : > { %v1958_v43 = vpop.eup %1957  ;;  %v564_v44 = vmul.f32 1.442695, %v2431_v39  ;;  %v1636_v45 = vpop.f32.mrb[10].mxu0  ;;  %1675 = vmatprep.mubr.f32.mxu1 %v596_v42  ;;  %v1443_v47 = vadd.f32 -1.0, %v1956_v40  ;;  %vm540_vm9 = vcmp.gt.f32.partialorder %v2431_v39, 0.0  ;;  %v866_v40 = vld [vmem:[%s2725_s5 + $0x30] sm:$0xff] }
 0x113   : > { %1967 = vpow2.f32 %v566_v41  ;;  %v2436_v48 = vadd.f32 %v1636_v45, %v2405_v7  ;;  %v503_v49 = vpop.f32.mrb[11].mxu0  ;;  %1676 = vmatmul.mubr.f32.vlgmr.msra.gmra.mrb[0].mxu1 %v597_v46  ;;  %v1442_v50 = vadd.f32 -1.0, %v1958_v43  ;;  %v867_v41 = vld [vmem:[%s2725_s5 + $0x38] sm:$0xff]  ;;  %v868_v43 = vld [vmem:[%s2725_s5 + $0x40] sm:$0xff]  ;;  %v870_v46 = vld [vmem:[%s2725_s5 + $0x50] sm:$0xff] }
 0x114   : > { %1969 = vpow2.f32 %v564_v44  ;;  %v2439_v51 = vadd.f32 %v2405_v7, %v503_v49  ;;  %1855 = vmatpush3.bf16.msra.mxu1 %v2380_v1  ;;  %v599_v58 = vsel %vm535_vm4, %v469_v15, %v1443_v47  ;;  %v1827_v42 = vpack.c.bf16 %v867_v41, %v866_v40  ;;  %v869_v44 = vld [vmem:[%s2725_s5 + $0x48] sm:$0xff]  ;;  %v871_v47 = vld [vmem:[%s2725_s5 + $0x58] sm:$0xff]  ;;  %v872_v49 = vld [vmem:[%s2725_s5 + $0x60] sm:$0xff] }
 0x115   : > { %v1960_v52 = vpop.eup %1959  ;;  %v570_v53 = vmul.f32 1.442695, %v2436_v48  ;;  %v598_v54 = vsel %vm534_vm3, %v464_v17, %v1442_v50  ;;  %1848 = vmatprep.subr.bf16.mxu1 %v2385_v3  ;;  %vm543_vm12 = vcmp.gt.f32.partialorder %v2436_v48, 0.0  ;;  %v1831_v45 = vpack.c.bf16 %v869_v44, %v868_v43  ;;  %v873_v50 = vld [vmem:[%s2725_s5 + $0x68] sm:$0xff] }
 0x116   : > { %v1962_v55 = vpop.eup %1961  ;;  %v568_v56 = vmul.f32 1.442695, %v2439_v51  ;;  %v1639_v57 = vpop.f32.mrb[12].mxu0  ;;  %1678 = vmatprep.mubr.f32.mxu1 %v598_v54  ;;  %v1445_v59 = vadd.f32 -1.0, %v1960_v52  ;;  %vm542_vm11 = vcmp.gt.f32.partialorder %v2439_v51, 0.0  ;;  %1828 = vmatprep.subr.bf16.mxu0 %v1827_v42  ;;  %v874_v52 = vld [vmem:[%s2725_s5 + $0x70] sm:$0xff] }
 0x117   : > { %1971 = vpow2.f32 %v570_v53  ;;  %v2446_v60 = vadd.f32 %v1639_v57, %v2405_v7  ;;  %v513_v61 = vpop.f32.mrb[13].mxu0  ;;  %1679 = vmatmul.mubr.f32.gmra.mrb[2].mxu1 %v599_v58  ;;  %v1444_v62 = vadd.f32 -1.0, %v1962_v55  ;;  %1830 = vmatpush3.bf16.msra.mxu0 %v1827_v42  ;;  %v875_v53 = vld [vmem:[%s2725_s5 + $0x78] sm:$0xff]  ;;  %v2506_v55 = vld [vmem:[%s2724_s4] ss:$0 sm:$0xff] }
 0x118   : > { %1973 = vpow2.f32 %v568_v56  ;;  %v514_v63 = vadd.f32 %v2405_v7, %v513_v61  ;;  %1856 = vmatpush3.bf16.msra.mxu1 %v2385_v3  ;;  %v601_v9 = vsel %vm537_vm6, %v2412_v21, %v1445_v59  ;;  %1832 = vmatprep.subr.bf16.mxu0 %v1831_v45  ;;  %v1843_v54 = vpack.c.bf16 %v875_v53, %v874_v52 }
 0x119   : > { %v1964_v0 = vpop.eup %1963  ;;  %v574_v1 = vmul.f32 1.442695, %v2446_v60  ;;  %v600_v2 = vsel %vm536_vm5, %v2415_v23, %v1444_v62  ;;  %1849 = vmatprep.subr.bf16.mxu1 %v2397_v6  ;;  %vm545_vm14 = vcmp.gt.f32.partialorder %v2446_v60, 0.0 }
 0x11a   : > { %v1966_v4 = vpop.eup %1965  ;;  %v572_v5 = vmul.f32 1.442695, %v514_v63  ;;  %v1642_v8 = vpop.f32.mrb[14].mxu0  ;;  %1681 = vmatprep.mubr.f32.mxu1 %v600_v2  ;;  %v1447_v10 = vadd.f32 -1.0, %v1964_v0  ;;  %vm544_vm13 = vcmp.gt.f32.partialorder %v514_v63, 0.0 }
 0x11b   : > { %1975 = vpow2.f32 %v574_v1  ;;  %v529_v11 = vadd.f32 %v1642_v8, %v2405_v7  ;;  %v523_v3 = vpop.f32.mrb[15].mxu0  ;;  %1682 = vmatmul.mubr.f32.gmra.mrb[4].mxu1 %v601_v9  ;;  %v1446_v12 = vadd.f32 -1.0, %v1966_v4  ;;  %1834 = vmatpush3.bf16.msra.mxu0 %v1831_v45 }
 0x11c   : > { %1977 = vpow2.f32 %v572_v5  ;;  %v524_v13 = vadd.f32 %v2405_v7, %v523_v3  ;;  %1857 = vmatpush3.bf16.msra.mxu1 %v2397_v6  ;;  %v603_v19 = vsel %vm539_vm8, %v2420_v27, %v1447_v10 }
 0x11d   : > { %v1968_v14 = vpop.eup %1967  ;;  %v578_v15 = vmul.f32 1.442695, %v529_v11  ;;  %v602_v16 = vsel %vm538_vm7, %v2423_v29, %v1446_v12  ;;  %vm547_vm0 = vcmp.gt.f32.partialorder %v529_v11, 0.0  ;;  %1850 = vmatprep.subr.bf16.mxu1 %v1827_v42 }
 0x11e   : > { %v1970_v17 = vpop.eup %1969  ;;  %v576_v18 = vmul.f32 1.442695, %v524_v13  ;;  %1684 = vmatprep.mubr.f32.mxu1 %v602_v16  ;;  %v1449_v20 = vadd.f32 -1.0, %v1968_v14  ;;  %vm546_vm15 = vcmp.gt.f32.partialorder %v524_v13, 0.0 }
 0x11f   : > { %1979 = vpow2.f32 %v578_v15  ;;  %1685 = vmatmul.mubr.f32.gmra.mrb[6].mxu1 %v603_v19  ;;  %v1448_v21 = vadd.f32 -1.0, %v1970_v17 }
 0x120   : > { %1981 = vpow2.f32 %v576_v18  ;;  %v605_v23 = vsel %vm541_vm10, %v2428_v36, %v1449_v20  ;;  %1858 = vmatpush3.bf16.msra.mxu1 %v1827_v42 }
 0x121   : > { %v1972_v7 = vpop.eup %1971  ;;  %v604_v6 = vsel %vm540_vm9, %v2431_v39, %v1448_v21  ;;  %1851 = vmatprep.subr.bf16.mxu1 %v1831_v45 }
 0x122   : > { %v1974_v22 = vpop.eup %1973  ;;  %1687 = vmatprep.mubr.f32.mxu1 %v604_v6  ;;  %v1451_v24 = vadd.f32 -1.0, %v1972_v7 }
 0x123   : > { %1688 = vmatmul.mubr.f32.gmra.mrb[8].mxu1 %v605_v23  ;;  %v1450_v25 = vadd.f32 -1.0, %v1974_v22 }
 0x124   : > { %v607_v29 = vsel %vm543_vm12, %v2436_v48, %v1451_v24  ;;  %1859 = vmatpush3.bf16.msra.mxu1 %v1831_v45  ;;  %v1835_v48 = vpack.c.bf16 %v871_v47, %v870_v46 }
 0x125   : > { %v1976_v26 = vpop.eup %1975  ;;  %v606_v27 = vsel %vm542_vm11, %v2439_v51, %v1450_v25  ;;  %v1839_v51 = vpack.c.bf16 %v873_v50, %v872_v49 }
 0x126   : > { %v1978_v28 = vpop.eup %1977  ;;  %1690 = vmatprep.mubr.f32.mxu1 %v606_v27  ;;  %v1453_v30 = vadd.f32 -1.0, %v1976_v26  ;;  %1836 = vmatprep.subr.bf16.mxu0 %v1835_v48 }
 0x127   : > { %1691 = vmatmul.mubr.f32.gmra.mrb[10].mxu1 %v607_v29  ;;  %v1452_v31 = vadd.f32 -1.0, %v1978_v28  ;;  %1852 = vmatprep.subr.bf16.mxu1 %v1835_v48 }
 0x128   : > { %v609_v35 = vsel %vm545_vm14, %v2446_v60, %v1453_v30  ;;  %1838 = vmatpush3.bf16.msra.mxu0 %v1835_v48  ;;  %1860 = vmatpush3.bf16.msra.mxu1 %v1835_v48 }
 0x129   : > { %v1980_v32 = vpop.eup %1979  ;;  %v608_v33 = vsel %vm544_vm13, %v514_v63, %v1452_v31  ;;  %1840 = vmatprep.subr.bf16.mxu0 %v1839_v51  ;;  %1853 = vmatprep.subr.bf16.mxu1 %v1839_v51 }
 0x12a   : > { %v1982_v34 = vpop.eup %1981  ;;  %1693 = vmatprep.mubr.f32.mxu1 %v608_v33  ;;  %v1455_v36 = vadd.f32 -1.0, %v1980_v32 }
 0x12b   : > { %1694 = vmatmul.mubr.f32.gmra.mrb[12].mxu1 %v609_v35  ;;  %v1454_v37 = vadd.f32 -1.0, %v1982_v34 }
 0x12c   : > { %v611_v39 = vsel %vm547_vm0, %v529_v11, %v1455_v36  ;;  %1842 = vmatpush3.bf16.msra.mxu0 %v1839_v51  ;;  %1861 = vmatpush3.bf16.msra.mxu1 %v1839_v51 }
 0x12d   : > { %v610_v38 = vsel %vm546_vm15, %v524_v13, %v1454_v37  ;;  %1844 = vmatprep.subr.bf16.mxu0 %v1843_v54  ;;  %1854 = vmatprep.subr.bf16.mxu1 %v1843_v54 }
 0x12e   : > { %1696 = vmatprep.mubr.f32.mxu1 %v610_v38 }
 0x12f   : > { %1697 = vmatmul.mubr.f32.gmra.mrb[14].mxu1 %v611_v39 }
 0x130   : > { %1846 = vmatpush3.bf16.msra.mxu0 %v1843_v54  ;;  %1862 = vmatpush3.bf16.msra.mxu1 %v1843_v54 }
 0x1e6   : > { %v1677_v56 = vpop.f32.mrb[0].mxu1 }
 0x1e7   : > { %v707_v57 = vadd.f32 %v1677_v56, %v2506_v55  ;;  %v701_v58 = vpop.f32.mrb[1].mxu1 }
 0x1e8   : > { %v702_v59 = vadd.f32 %v2506_v55, %v701_v58 }
 0x1e9   : > { %v798_v60 = vmul.f32 1.442695, %v707_v57  ;;  %vm781_vm2 = vcmp.gt.f32.partialorder %v707_v57, 0.0 }
 0x1ea   : > { %v796_v61 = vmul.f32 1.442695, %v702_v59  ;;  %v1680_v62 = vpop.f32.mrb[2].mxu1  ;;  %vm780_vm1 = vcmp.gt.f32.partialorder %v702_v59, 0.0 }
 0x1eb   : > { %1983 = vpow2.f32 %v798_v60  ;;  %v717_v63 = vadd.f32 %v1680_v62, %v2506_v55  ;;  %v711_v0 = vpop.f32.mrb[3].mxu1 }
 0x1ec   : > { %1985 = vpow2.f32 %v796_v61  ;;  %v712_v1 = vadd.f32 %v2506_v55, %v711_v0 }
 0x1ed   : > { %v802_v2 = vmul.f32 1.442695, %v717_v63  ;;  %vm783_vm4 = vcmp.gt.f32.partialorder %v717_v63, 0.0 }
 0x1ee   : > { %v800_v4 = vmul.f32 1.442695, %v712_v1  ;;  %v1683_v5 = vpop.f32.mrb[4].mxu1  ;;  %vm782_vm3 = vcmp.gt.f32.partialorder %v712_v1, 0.0 }
 0x1ef   : > { %1987 = vpow2.f32 %v802_v2  ;;  %v2513_v8 = vadd.f32 %v1683_v5, %v2506_v55  ;;  %v721_v9 = vpop.f32.mrb[5].mxu1 }
 0x1f0   : > { %1989 = vpow2.f32 %v800_v4  ;;  %v722_v10 = vadd.f32 %v2506_v55, %v721_v9 }
 0x1f1   : > { %v806_v11 = vmul.f32 1.442695, %v2513_v8  ;;  %vm785_vm6 = vcmp.gt.f32.partialorder %v2513_v8, 0.0 }
 0x1f2   : > { %v804_v3 = vmul.f32 1.442695, %v722_v10  ;;  %v1686_v12 = vpop.f32.mrb[6].mxu1  ;;  %vm784_vm5 = vcmp.gt.f32.partialorder %v722_v10, 0.0 }
 0x1f3   : > { %1991 = vpow2.f32 %v806_v11  ;;  %v2518_v13 = vadd.f32 %v1686_v12, %v2506_v55  ;;  %v731_v14 = vpop.f32.mrb[7].mxu1 }
 0x1f4   : > { %1993 = vpow2.f32 %v804_v3  ;;  %v2521_v15 = vadd.f32 %v2506_v55, %v731_v14 }
 0x1f5   : > { %v1984_v16 = vpop.eup %1983  ;;  %v810_v17 = vmul.f32 1.442695, %v2518_v13  ;;  %vm787_vm8 = vcmp.gt.f32.partialorder %v2518_v13, 0.0 }
 0x1f6   : > { %v1986_v18 = vpop.eup %1985  ;;  %v1458_v19 = vadd.f32 -1.0, %v1984_v16  ;;  %v808_v20 = vmul.f32 1.442695, %v2521_v15  ;;  %v1689_v21 = vpop.f32.mrb[8].mxu1  ;;  %vm786_vm7 = vcmp.gt.f32.partialorder %v2521_v15, 0.0 }
 0x1f7   : > { %1995 = vpow2.f32 %v810_v17  ;;  %v2526_v7 = vadd.f32 %v1689_v21, %v2506_v55  ;;  %v741_v6 = vpop.f32.mrb[9].mxu1  ;;  %v1457_v22 = vadd.f32 -1.0, %v1986_v18 }
 0x1f8   : > { %1997 = vpow2.f32 %v808_v20  ;;  %v2529_v23 = vadd.f32 %v2506_v55, %v741_v6  ;;  %v845_v28 = vsel %vm781_vm2, %v707_v57, %v1458_v19 }
 0x1f9   : > { %v1988_v24 = vpop.eup %1987  ;;  %v814_v25 = vmul.f32 1.442695, %v2526_v7  ;;  %v844_v26 = vsel %vm780_vm1, %v702_v59, %v1457_v22  ;;  %vm789_vm10 = vcmp.gt.f32.partialorder %v2526_v7, 0.0  ;;  %vm1124_vm1 = vcmask 195584  }
 0x1fa   : > { %v1990_v27 = vpop.eup %1989  ;;  %v812_v29 = vmul.f32 1.442695, %v2529_v23  ;;  %v1692_v30 = vpop.f32.mrb[10].mxu1  ;;  %1731 = vmatprep.mubr.f32.mxu0 %v844_v26  ;;  %v1460_v31 = vadd.f32 -1.0, %v1988_v24  ;;  %vm788_vm9 = vcmp.gt.f32.partialorder %v2529_v23, 0.0 }
 0x1fb   : > { %1999 = vpow2.f32 %v814_v25  ;;  %v2534_v32 = vadd.f32 %v1692_v30, %v2506_v55  ;;  %v751_v33 = vpop.f32.mrb[11].mxu1  ;;  %1732 = vmatmul.mubr.f32.vlgmr.msra.gmra.mrb[16].mxu0 %v845_v28  ;;  %v1459_v34 = vadd.f32 -1.0, %v1990_v27  ;;  %v2567_v24 = vld [vmem:[%s2726_s6] ss:$0 sm:$0xff] }
 0x1fc   : > { %2001 = vpow2.f32 %v812_v29  ;;  %v2537_v35 = vadd.f32 %v2506_v55, %v751_v33  ;;  %v847_v42 = vsel %vm783_vm4, %v717_v63, %v1460_v31 }
 0x1fd   : > { %v1992_v36 = vpop.eup %1991  ;;  %v818_v37 = vmul.f32 1.442695, %v2534_v32  ;;  %v846_v38 = vsel %vm782_vm3, %v712_v1, %v1459_v34  ;;  %vm791_vm12 = vcmp.gt.f32.partialorder %v2534_v32, 0.0 }
 0x1fe   : > { %v1994_v39 = vpop.eup %1993  ;;  %v816_v40 = vmul.f32 1.442695, %v2537_v35  ;;  %v1695_v41 = vpop.f32.mrb[12].mxu1  ;;  %1734 = vmatprep.mubr.f32.mxu0 %v846_v38  ;;  %v1462_v43 = vadd.f32 -1.0, %v1992_v36  ;;  %vm790_vm11 = vcmp.gt.f32.partialorder %v2537_v35, 0.0 }
 0x1ff   : > { %2003 = vpow2.f32 %v818_v37  ;;  %v2542_v44 = vadd.f32 %v1695_v41, %v2506_v55  ;;  %v761_v45 = vpop.f32.mrb[13].mxu1  ;;  %1735 = vmatmul.mubr.f32.gmra.mrb[18].mxu0 %v847_v42  ;;  %v1461_v46 = vadd.f32 -1.0, %v1994_v39 }
 0x200   : > { %2005 = vpow2.f32 %v816_v40  ;;  %v762_v47 = vadd.f32 %v2506_v55, %v761_v45  ;;  %v849_v54 = vsel %vm785_vm6, %v2513_v8, %v1462_v43 }
 0x201   : > { %v1996_v48 = vpop.eup %1995  ;;  %v822_v49 = vmul.f32 1.442695, %v2542_v44  ;;  %v848_v50 = vsel %vm784_vm5, %v722_v10, %v1461_v46  ;;  %vm793_vm14 = vcmp.gt.f32.partialorder %v2542_v44, 0.0 }
 0x202   : > { %v1998_v51 = vpop.eup %1997  ;;  %v820_v52 = vmul.f32 1.442695, %v762_v47  ;;  %v1698_v53 = vpop.f32.mrb[14].mxu1  ;;  %1737 = vmatprep.mubr.f32.mxu0 %v848_v50  ;;  %v1464_v56 = vadd.f32 -1.0, %v1996_v48  ;;  %vm792_vm13 = vcmp.gt.f32.partialorder %v762_v47, 0.0 }
 0x203   : > { %2007 = vpow2.f32 %v822_v49  ;;  %v777_v57 = vadd.f32 %v1698_v53, %v2506_v55  ;;  %v771_v58 = vpop.f32.mrb[15].mxu1  ;;  %1738 = vmatmul.mubr.f32.gmra.mrb[20].mxu0 %v849_v54  ;;  %v1463_v59 = vadd.f32 -1.0, %v1998_v51 }
 0x204   : > { %2009 = vpow2.f32 %v820_v52  ;;  %v772_v60 = vadd.f32 %v2506_v55, %v771_v58  ;;  %v851_v2 = vsel %vm787_vm8, %v2518_v13, %v1464_v56 }
 0x205   : > { %v2000_v61 = vpop.eup %1999  ;;  %v826_v62 = vmul.f32 1.442695, %v777_v57  ;;  %v850_v63 = vsel %vm786_vm7, %v2521_v15, %v1463_v59  ;;  %vm795_vm0 = vcmp.gt.f32.partialorder %v777_v57, 0.0 }
 0x206   : > { %v2002_v0 = vpop.eup %2001  ;;  %v824_v1 = vmul.f32 1.442695, %v772_v60  ;;  %1740 = vmatprep.mubr.f32.mxu0 %v850_v63  ;;  %v1466_v4 = vadd.f32 -1.0, %v2000_v61  ;;  %vm794_vm15 = vcmp.gt.f32.partialorder %v772_v60, 0.0 }
 0x207   : > { %2011 = vpow2.f32 %v826_v62  ;;  %1741 = vmatmul.mubr.f32.gmra.mrb[22].mxu0 %v851_v2  ;;  %v1465_v5 = vadd.f32 -1.0, %v2002_v0 }
 0x208   : > { %2013 = vpow2.f32 %v824_v1  ;;  %v853_v11 = vsel %vm789_vm10, %v2526_v7, %v1466_v4 }
 0x209   : > { %v2004_v55 = vpop.eup %2003  ;;  %v852_v8 = vsel %vm788_vm9, %v2529_v23, %v1465_v5 }
 0x20a   : > { %v2006_v9 = vpop.eup %2005  ;;  %v1468_v10 = vadd.f32 -1.0, %v2004_v55  ;;  %1743 = vmatprep.mubr.f32.mxu0 %v852_v8 }
 0x20b   : > { %1744 = vmatmul.mubr.f32.gmra.mrb[24].mxu0 %v853_v11  ;;  %v1467_v3 = vadd.f32 -1.0, %v2006_v9 }
 0x20c   : > { %v855_v15 = vsel %vm791_vm12, %v2534_v32, %v1468_v10 }
 0x20d   : > { %v2008_v12 = vpop.eup %2007  ;;  %v854_v13 = vsel %vm790_vm11, %v2537_v35, %v1467_v3 }
 0x20e   : > { %v2010_v14 = vpop.eup %2009  ;;  %1746 = vmatprep.mubr.f32.mxu1 %v854_v13  ;;  %v1470_v16 = vadd.f32 -1.0, %v2008_v12 }
 0x20f   : > { %1747 = vmatmul.mubr.f32.vlgmr.msra.gmra.mrb[16].mxu1 %v855_v15  ;;  %v1469_v17 = vadd.f32 -1.0, %v2010_v14 }
 0x210   : > { %v857_v21 = vsel %vm793_vm14, %v2542_v44, %v1470_v16 }
 0x211   : > { %v2012_v18 = vpop.eup %2011  ;;  %v856_v19 = vsel %vm792_vm13, %v762_v47, %v1469_v17 }
 0x212   : > { %v2014_v20 = vpop.eup %2013  ;;  %1749 = vmatprep.mubr.f32.mxu1 %v856_v19  ;;  %v1472_v7 = vadd.f32 -1.0, %v2012_v18 }
 0x213   : > { %1750 = vmatmul.mubr.f32.gmra.mrb[18].mxu1 %v857_v21  ;;  %v1471_v6 = vadd.f32 -1.0, %v2014_v20 }
 0x214   : > { %v859_v23 = vsel %vm795_vm0, %v777_v57, %v1472_v7 }
 0x215   : > { %v858_v22 = vsel %vm794_vm15, %v772_v60, %v1471_v6 }
 0x216   : > { %1752 = vmatprep.mubr.f32.mxu1 %v858_v22 }
 0x217   : > { %1753 = vmatmul.mubr.f32.gmra.mrb[20].mxu1 %v859_v23 }
 0x2ce   : > { %v1733_v25 = vpop.f32.mrb[16].mxu0 }
 0x2cf   : > { %v955_v26 = vadd.f32 %v1733_v25, %v2567_v24  ;;  %v949_v27 = vpop.f32.mrb[17].mxu0 }
 0x2d0   : > { %v950_v28 = vadd.f32 %v2567_v24, %v949_v27 }
 0x2d1   : > { %v1029_v29 = vsub.f32 0.0, %v955_v26 }
 0x2d2   : > { %v1028_v30 = vsub.f32 0.0, %v950_v28  ;;  %v1736_v31 = vpop.f32.mrb[18].mxu0 }
 0x2d3   : > { %v1046_v32 = vmul.f32 1.442695, %v1029_v29  ;;  %v965_v33 = vadd.f32 %v1736_v31, %v2567_v24  ;;  %v959_v34 = vpop.f32.mrb[19].mxu0 }
 0x2d4   : > { %v1044_v35 = vmul.f32 1.442695, %v1028_v30  ;;  %v960_v36 = vadd.f32 %v2567_v24, %v959_v34 }
 0x2d5   : > { %2015 = vpow2.f32 %v1046_v32  ;;  %v1031_v37 = vsub.f32 0.0, %v965_v33 }
 0x2d6   : > { %2017 = vpow2.f32 %v1044_v35  ;;  %v1030_v38 = vsub.f32 0.0, %v960_v36  ;;  %v1739_v39 = vpop.f32.mrb[20].mxu0 }
 0x2d7   : > { %v1050_v40 = vmul.f32 1.442695, %v1031_v37  ;;  %v975_v41 = vadd.f32 %v1739_v39, %v2567_v24  ;;  %v969_v42 = vpop.f32.mrb[21].mxu0 }
 0x2d8   : > { %v1048_v43 = vmul.f32 1.442695, %v1030_v38  ;;  %v970_v44 = vadd.f32 %v2567_v24, %v969_v42 }
 0x2d9   : > { %2019 = vpow2.f32 %v1050_v40  ;;  %v1033_v45 = vsub.f32 0.0, %v975_v41 }
 0x2da   : > { %2021 = vpow2.f32 %v1048_v43  ;;  %v1032_v46 = vsub.f32 0.0, %v970_v44  ;;  %v1742_v47 = vpop.f32.mrb[22].mxu0 }
 0x2db   : > { %v1054_v48 = vmul.f32 1.442695, %v1033_v45  ;;  %v985_v49 = vadd.f32 %v1742_v47, %v2567_v24  ;;  %v979_v50 = vpop.f32.mrb[23].mxu0 }
 0x2dc   : > { %v1052_v51 = vmul.f32 1.442695, %v1032_v46  ;;  %v980_v52 = vadd.f32 %v2567_v24, %v979_v50 }
 0x2dd   : > { %2023 = vpow2.f32 %v1054_v48  ;;  %v1035_v53 = vsub.f32 0.0, %v985_v49 }
 0x2de   : > { %2025 = vpow2.f32 %v1052_v51  ;;  %v1034_v54 = vsub.f32 0.0, %v980_v52  ;;  %v1745_v56 = vpop.f32.mrb[24].mxu0 }
 0x2df   : > { %v2016_v57 = vpop.eup %2015  ;;  %v1058_v58 = vmul.f32 1.442695, %v1035_v53  ;;  %v995_v59 = vadd.f32 %v1745_v56, %v2567_v24  ;;  %v989_v60 = vpop.f32.mrb[25].mxu0 }
 0x2e0   : > { %v2018_v61 = vpop.eup %2017  ;;  %v1077_v62 = vadd.f32 1.0, %v2016_v57  ;;  %v1056_v63 = vmul.f32 1.442695, %v1034_v54  ;;  %v990_v0 = vadd.f32 %v2567_v24, %v989_v60 }
 0x2e1   : > { %v1076_v1 = vadd.f32 1.0, %v2018_v61  ;;  %2027 = vpow2.f32 %v1058_v58  ;;  %v1037_v2 = vsub.f32 0.0, %v995_v59 }
 0x2e2   : > { %2029 = vrcp.f32 %v1077_v62  ;;  %v1036_v4 = vsub.f32 0.0, %v990_v0  ;;  %v1748_v5 = vpop.f32.mrb[16].mxu1 }
 0x2e3   : > { %v2020_v55 = vpop.eup %2019  ;;  %2031 = vrcp.f32 %v1076_v1  ;;  %v1062_v8 = vmul.f32 1.442695, %v1037_v2  ;;  %v1005_v9 = vadd.f32 %v1748_v5, %v2567_v24  ;;  %v999_v10 = vpop.f32.mrb[17].mxu1 }
 0x2e4   : > { %v2022_v11 = vpop.eup %2021  ;;  %v1079_v3 = vadd.f32 1.0, %v2020_v55  ;;  %2033 = vpow2.f32 %v1056_v63  ;;  %v1060_v12 = vmul.f32 1.442695, %v1036_v4  ;;  %v1000_v13 = vadd.f32 %v2567_v24, %v999_v10 }
 0x2e5   : > { %v1078_v14 = vadd.f32 1.0, %v2022_v11  ;;  %2035 = vpow2.f32 %v1062_v8  ;;  %v1039_v15 = vsub.f32 0.0, %v1005_v9 }
 0x2e6   : > { %2037 = vrcp.f32 %v1079_v3  ;;  %v1038_v16 = vsub.f32 0.0, %v1000_v13  ;;  %v1751_v17 = vpop.f32.mrb[18].mxu1 }
 0x2e7   : > { %v2024_v18 = vpop.eup %2023  ;;  %2039 = vrcp.f32 %v1078_v14  ;;  %v1066_v19 = vmul.f32 1.442695, %v1039_v15  ;;  %v1015_v20 = vadd.f32 %v1751_v17, %v2567_v24  ;;  %v1009_v21 = vpop.f32.mrb[19].mxu1 }
 0x2e8   : > { %v2026_v7 = vpop.eup %2025  ;;  %v1081_v6 = vadd.f32 1.0, %v2024_v18  ;;  %2041 = vpow2.f32 %v1060_v12  ;;  %v1064_v22 = vmul.f32 1.442695, %v1038_v16  ;;  %v1010_v23 = vadd.f32 %v2567_v24, %v1009_v21 }
 0x2e9   : > { %v1080_v25 = vadd.f32 1.0, %v2026_v7  ;;  %2043 = vpow2.f32 %v1066_v19  ;;  %v1041_v26 = vsub.f32 0.0, %v1015_v20 }
 0x2ea   : > { %2045 = vrcp.f32 %v1081_v6  ;;  %v1040_v27 = vsub.f32 0.0, %v1010_v23  ;;  %v1754_v28 = vpop.f32.mrb[20].mxu1 }
 0x2eb   : > { %v2028_v29 = vpop.eup %2027  ;;  %2047 = vrcp.f32 %v1080_v25  ;;  %v1070_v30 = vmul.f32 1.442695, %v1041_v26  ;;  %v1025_v31 = vadd.f32 %v1754_v28, %v2567_v24  ;;  %v1019_v32 = vpop.f32.mrb[21].mxu1 }
 0x2ec   : > { %v2030_v33 = vpop.eup %2029  ;;  %v1083_v34 = vadd.f32 1.0, %v2028_v29  ;;  %2049 = vpow2.f32 %v1064_v22  ;;  %v1068_v35 = vmul.f32 1.442695, %v1040_v27  ;;  %v1020_v36 = vadd.f32 %v2567_v24, %v1019_v32 }
 0x2ed   : > { %v2032_v37 = vpop.eup %2031  ;;  %1126 = vst.msk [vmem:[%s2586_s24 + $0x8] sm:$0xff] %vm1124_vm1, %v2030_v33  ;;  %2051 = vpow2.f32 %v1070_v30  ;;  %v1043_v38 = vsub.f32 0.0, %v1025_v31 }
 0x2ee   : > { %v2034_v39 = vpop.eup %2033  ;;  %1125 = vst.msk [vmem:[%s2586_s24] sm:$0xff] %vm1124_vm1, %v2032_v37  ;;  %2053 = vrcp.f32 %v1083_v34  ;;  %v1042_v40 = vsub.f32 0.0, %v1020_v36 }
 0x2ef   : > { %v2036_v41 = vpop.eup %2035  ;;  %v1082_v42 = vadd.f32 1.0, %v2034_v39  ;;  %2055 = vpow2.f32 %v1068_v35  ;;  %v1074_v24 = vmul.f32 1.442695, %v1043_v38 }
 0x2f0   : > { %v2038_v43 = vpop.eup %2037  ;;  %v1085_v44 = vadd.f32 1.0, %v2036_v41  ;;  %v1072_v45 = vmul.f32 1.442695, %v1042_v40 }
 0x2f1   : > { %v2040_v46 = vpop.eup %2039  ;;  %1128 = vst.msk [vmem:[%s2586_s24 + $0x18] sm:$0xff] %vm1124_vm1, %v2038_v43  ;;  %2057 = vrcp.f32 %v1082_v42 }
 0x2f2   : > { %v2042_v47 = vpop.eup %2041  ;;  %1127 = vst.msk [vmem:[%s2586_s24 + $0x10] sm:$0xff] %vm1124_vm1, %v2040_v46  ;;  %2059 = vrcp.f32 %v1085_v44 }
 0x2f3   : > { %v2044_v48 = vpop.eup %2043  ;;  %v1084_v49 = vadd.f32 1.0, %v2042_v47  ;;  %2061 = vpow2.f32 %v1074_v24 }
 0x2f4   : > { %v2046_v50 = vpop.eup %2045  ;;  %v1087_v51 = vadd.f32 1.0, %v2044_v48  ;;  %2063 = vpow2.f32 %v1072_v45 }
 0x2f5   : > { %v2048_v52 = vpop.eup %2047  ;;  %1130 = vst.msk [vmem:[%s2586_s24 + $0x28] sm:$0xff] %vm1124_vm1, %v2046_v50  ;;  %2065 = vrcp.f32 %v1084_v49 }
 0x2f6   : > { %v2050_v53 = vpop.eup %2049  ;;  %1129 = vst.msk [vmem:[%s2586_s24 + $0x20] sm:$0xff] %vm1124_vm1, %v2048_v52  ;;  %2067 = vrcp.f32 %v1087_v51 }
 0x2f7   : > { %v2052_v54 = vpop.eup %2051  ;;  %v1086_v56 = vadd.f32 1.0, %v2050_v53 }
 0x2f8   : > { %v2054_v57 = vpop.eup %2053  ;;  %v1089_v58 = vadd.f32 1.0, %v2052_v54 }
 0x2f9   : > { %v2056_v59 = vpop.eup %2055  ;;  %1132 = vst.msk [vmem:[%s2586_s24 + $0x38] sm:$0xff] %vm1124_vm1, %v2054_v57  ;;  %2069 = vrcp.f32 %v1086_v56 }
 0x2fa   : > { %2071 = vrcp.f32 %v1089_v58  ;;  %v1088_v60 = vadd.f32 1.0, %v2056_v59 }
 0x2fb   : > { %v2058_v61 = vpop.eup %2057 }
 0x2fc   : > { %v2060_v62 = vpop.eup %2059  ;;  %1131 = vst.msk [vmem:[%s2586_s24 + $0x30] sm:$0xff] %vm1124_vm1, %v2058_v61  ;;  %2073 = vrcp.f32 %v1088_v60 }
 0x2fd   : > { %v2062_v63 = vpop.eup %2061  ;;  %1134 = vst.msk [vmem:[%s2586_s24 + $0x48] sm:$0xff] %vm1124_vm1, %v2060_v62 }
 0x2fe   : > { %v2064_v0 = vpop.eup %2063  ;;  %v1091_v1 = vadd.f32 1.0, %v2062_v63 }
 0x2ff   : > { %v2066_v2 = vpop.eup %2065  ;;  %v1090_v4 = vadd.f32 1.0, %v2064_v0 }
 0x300   : > { %v2068_v5 = vpop.eup %2067  ;;  %1133 = vst.msk [vmem:[%s2586_s24 + $0x40] sm:$0xff] %vm1124_vm1, %v2066_v2  ;;  %2075 = vrcp.f32 %v1091_v1 }
 0x301   : > { %1136 = vst.msk [vmem:[%s2586_s24 + $0x58] sm:$0xff] %vm1124_vm1, %v2068_v5  ;;  %2077 = vrcp.f32 %v1090_v4 }
 0x303   : > { %v2070_v55 = vpop.eup %2069 }
 0x304   : > { %v2072_v8 = vpop.eup %2071  ;;  %1135 = vst.msk [vmem:[%s2586_s24 + $0x50] sm:$0xff] %vm1124_vm1, %v2070_v55 }
 0x305   : > { %1138 = vst.msk [vmem:[%s2586_s24 + $0x68] sm:$0xff] %vm1124_vm1, %v2072_v8 }
 0x306   : > { %v2074_v9 = vpop.eup %2073  ;;  %1147 = sbr.rel (!%p2232_p4) target bundleno = 830 (0x33e), region = 52 }
 0x307   : > { %1137 = vst.msk [vmem:[%s2586_s24 + $0x60] sm:$0xff] %vm1124_vm1, %v2074_v9 }
 0x30a   : > { %v2076_v10 = vpop.eup %2075 }
 0x30b   : > { %v2078_v11 = vpop.eup %2077  ;;  %1140 = vst.msk [vmem:[%s2586_s24 + $0x78] sm:$0xff] %vm1124_vm1, %v2076_v10 }
 0x30c   : > { %1139 = vst.msk [vmem:[%s2586_s24 + $0x70] sm:$0xff] %vm1124_vm1, %v2078_v11 }
 0x30d   : > { %s2736_s23 = smov (!%p1150_p8, %s1149_s23), 16 }
 0x30e   : > { %s1476_s26 = sshll.u32 %s2736_s23, 7 }
 0x30f   : > { %p1479_p9 = scmp.eq.s32.totalorder %s1476_s26, 0 }
 0x310   : > { %s2633_s12 = sshrl.u32 (!%p1479_p9), %s2736_s23, 4 }
 0x311   : > { %1158 = sbr.rel (%p1479_p9) target bundleno = 830 (0x33e), region = 56  ;;  %p1480_p10 = scmp.le.s32.totalorder (!%p1479_p9), %s2633_s12, 0 }
 0x318   : > { %1372 = sbr.rel (%p1480_p10) target bundleno = 809 (0x329), region = 132  ;;  %s2729_s27 = smov (!%p1480_p10), %s2627_s11 }
 0x319   : > { %s2730_s9 = smov (!%p1480_p10), %s2586_s24  ;;  %s2642_s16 = smov (!%p1480_p10), 0  }
 0x31a   : > { %s2644_s13 = smov (!%p1480_p10), 0  }
 0x31f LB: >> { %v1250_v3 = vld [vmem:[%s2141_s9] sm:$0xff]  ;;  %v1252_v12 = vld [vmem:[%s2141_s9 + $0x8] sm:$0xff]  ;;  %v1254_v13 = vld [vmem:[%s2141_s9 + $0x10] sm:$0xff]  ;;  %s1282_s14 = sadd.s32 1, %s2145_s16  ;;  %s1244_s13 = sadd.s32 1, %s2149_s13   ;;  %s2149_s13 = sphi %s2644_s13, %s1244_s13   ;;  %s2145_s16 = sphi %s2642_s16, %s2731_s16   ;;  %s2141_s9 = sphi %s2730_s9, %s1287_s9   ;;  %s2137_s27 = sphi %s2729_s27, %s1288_s27  }
 0x320   : >> { %1251 = vst [vmem:[%s2137_s27] sm:$0xff] %v1250_v3  ;;  %1253 = vst [vmem:[%s2137_s27 + $0x8] sm:$0xff] %v1252_v12  ;;  %v1256_v14 = vld [vmem:[%s2141_s9 + $0x18] sm:$0xff]  ;;  %v1258_v15 = vld [vmem:[%s2141_s9 + $0x20] sm:$0xff]  ;;  %p1283_p11 = scmp.ge.s32.totalorder %s1282_s14, %s2633_s12  ;;  %p1243_p12 = scmp.ge.s32.totalorder %s1244_s13, %s2633_s12 }
 0x321   : >> { %1255 = vst [vmem:[%s2137_s27 + $0x10] sm:$0xff] %v1254_v13  ;;  %v1260_v16 = vld [vmem:[%s2141_s9 + $0x28] sm:$0xff]  ;;  %1257 = vst [vmem:[%s2137_s27 + $0x18] sm:$0xff] %v1256_v14  ;;  %v1262_v17 = vld [vmem:[%s2141_s9 + $0x30] sm:$0xff] }
 0x322   : >> { %1259 = vst [vmem:[%s2137_s27 + $0x20] sm:$0xff] %v1258_v15  ;;  %1261 = vst [vmem:[%s2137_s27 + $0x28] sm:$0xff] %v1260_v16  ;;  %v1264_v18 = vld [vmem:[%s2141_s9 + $0x38] sm:$0xff]  ;;  %v1266_v19 = vld [vmem:[%s2141_s9 + $0x40] sm:$0xff]  ;;  %s2738_s14 = smov (%p1283_p11, %s1282_s14), 0  ;;  %1246 = sbr.rel (!%p1243_p12) target bundleno = 799 (0x31f), region = 138 }
 0x323   : >> { %1263 = vst [vmem:[%s2137_s27 + $0x30] sm:$0xff] %v1262_v17  ;;  %1265 = vst [vmem:[%s2137_s27 + $0x38] sm:$0xff] %v1264_v18  ;;  %v1268_v20 = vld [vmem:[%s2141_s9 + $0x48] sm:$0xff]  ;;  %v1270_v21 = vld [vmem:[%s2141_s9 + $0x50] sm:$0xff]  ;;  %s1481_s15 = sshll.u32 %s2738_s14, 7  ;;  %s2731_s16 = smov %s2738_s14 }
 0x324   : >> { %1267 = vst [vmem:[%s2137_s27 + $0x40] sm:$0xff] %v1266_v19  ;;  %v1272_v7 = vld [vmem:[%s2141_s9 + $0x58] sm:$0xff]  ;;  %1269 = vst [vmem:[%s2137_s27 + $0x48] sm:$0xff] %v1268_v20  ;;  %v1274_v6 = vld [vmem:[%s2141_s9 + $0x60] sm:$0xff] }
 0x325   : >> { %1271 = vst [vmem:[%s2137_s27 + $0x50] sm:$0xff] %v1270_v21  ;;  %1273 = vst [vmem:[%s2137_s27 + $0x58] sm:$0xff] %v1272_v7  ;;  %v1276_v22 = vld [vmem:[%s2141_s9 + $0x68] sm:$0xff]  ;;  %v1278_v23 = vld [vmem:[%s2141_s9 + $0x70] sm:$0xff] }
 0x326   : >> { %1275 = vst [vmem:[%s2137_s27 + $0x60] sm:$0xff] %v1274_v6  ;;  %1277 = vst [vmem:[%s2137_s27 + $0x68] sm:$0xff] %v1276_v22  ;;  %v1280_v25 = vld [vmem:[%s2141_s9 + $0x78] sm:$0xff]  ;;  %s1287_s9 = scalar_lea.vmem %s2586_s24, %s1481_s15 [#allocation2]  }
 0x327   : >> { %1279 = vst [vmem:[%s2137_s27 + $0x70] sm:$0xff] %v1278_v23  ;;  %1281 = vst [vmem:[%s2137_s27 + $0x78] sm:$0xff] %v1280_v25  ;;  %s1288_s27 = scalar_lea.vmem %s2627_s11, %s1481_s15  }
 0x329 PF: > { %s2702_s17 = sand.u32 15, %s2736_s23   ;;  %s1492_s18 = sshll.u32 %s2633_s12, 7 }
 0x32a   : > { %s1293_s21 = scalar_lea.vmem %s2586_s24, %s1492_s18 [#allocation2]   ;;  %s1295_s19 = scalar_lea.vmem %s2627_s11, %s1492_s18  }
 0x32b   : > { %p1486_p13 = scmp.le.s32.totalorder %s2702_s17, 0 }
 0x32c   : > { %s2151_s20 = smov (!%p1486_p13), %s1295_s19   ;;  %s2155_s22 = smov (!%p1486_p13), %s1293_s21  }
 0x32d   : > { %1386 = sbr.rel (%p1486_p13) target bundleno = 830 (0x33e), region = 143  ;;  %s2159_s29 = smov (!%p1486_p13), 0  }
 0x32e   : > { %s2163_s30 = smov (!%p1486_p13), 0  }
 0x334 LB: >> { %v1305_v26 = vld [vmem:[%s2157_s22] sm:$0xff]  ;;  %s1307_s23 = sadd.s32 1, %s2161_s29  ;;  %s1299_s30 = sadd.s32 1, %s2165_s30   ;;  %s2165_s30 = sphi %s2163_s30, %s1299_s30   ;;  %s2161_s29 = sphi %s2159_s29, %s2160_s29   ;;  %s2157_s22 = sphi %s2155_s22, %s1312_s22   ;;  %s2153_s20 = sphi %s2151_s20, %s1313_s20  }
 0x335   : >> { %1306 = vst [vmem:[%s2153_s20] sm:$0xff] %v1305_v26  ;;  %p1308_p0 = scmp.ge.s32.totalorder %s1307_s23, %s2702_s17  ;;  %p1298_p1 = scmp.ge.s32.totalorder %s1299_s30, %s2702_s17 }
 0x337   : >> { %s2740_s23 = smov (%p1308_p0, %s1307_s23), 0  ;;  %1301 = sbr.rel (!%p1298_p1) target bundleno = 820 (0x334), region = 149 }
 0x338   : >> { %s1487_s24 = sshll.u32 %s2740_s23, 3  ;;  %s2160_s29 = smov %s2740_s23  }
 0x339   : >> { %s1312_s22 = scalar_lea.vmem %s1293_s21, %s1487_s24 [#allocation2]   ;;  %s1313_s20 = scalar_lea.vmem %s1295_s19, %s1487_s24  }
 0x33e PF: > { %p14_p2 = scmp.ge.s32.totalorder %s2222_s28, 5   ;;  %s2732_s24 = smov %s2129_s25 }
 0x33f   : > { %s2733_s25 = smov %s2230_s8  ;;  %s2734_s26 = smov %s2222_s28 }
 0x340   :  { %16 = sbr.rel (!%p14_p2) target bundleno = 2 (0x2), region = 160 }

</bundles_post_ra>
